<compile_context>
chip_gen: v7x
topology: tpu7x:2x2x1
jax: 0.10.0
libtpu: 0.0.40
codegen_flags: <defaults>
</compile_context>

<pallas_src>
import math
import jax
import jax.numpy as jnp
from jax import lax
from jax.experimental import pallas as pl
from jax.experimental.pallas import tpu as pltpu


def _gelu_exact(x):
    # Matches torch.nn.GELU() default (erf-based, not tanh approximation).
    return 0.5 * x * (1.0 + lax.erf(x * (1.0 / math.sqrt(2.0))))


def _round_up(x, m):
    return ((x + m - 1) // m) * m


def mlp_kernel(x_ref, w1_ref, b1_ref, w2_ref, b2_ref, o_ref, acc_ref):
    k = pl.program_id(1)

    @pl.when(k == 0)
    def _init():
        acc_ref[...] = jnp.zeros_like(acc_ref)

    # fc1 for this hidden-dim chunk: native-dtype MXU operands, f32 accumulate.
    h = jnp.dot(x_ref[...], w1_ref[...], preferred_element_type=jnp.float32)
    h = h + b1_ref[...].astype(jnp.float32)
    # GELU (exact, erf-based)
    h = _gelu_exact(h)
    # dropout(p=0.0) -> identity
    # fc2 partial product over this hidden chunk, accumulated in f32 scratch.
    acc_ref[...] += jnp.dot(h.astype(x_ref.dtype), w2_ref[...],
                            preferred_element_type=jnp.float32)

    @pl.when(k == pl.num_programs(1) - 1)
    def _finalize():
        # dropout(p=0.0) -> identity
        o_ref[...] = (acc_ref[...] + b2_ref[...].astype(jnp.float32)).astype(o_ref.dtype)


def mlp_forward(x, w1, b1, w2, b2, *, row_tile=128, hid_tile=512):
    """x: (B, N, C_in). w1: (C_in, C_hid), b1: (1, C_hid), w2: (C_hid, C_out), b2: (1, C_out).
    Returns (B, N, C_out)."""
    B, N, C_in = x.shape
    C_hid = w1.shape[1]
    C_out = w2.shape[1]
    M = B * N

    # Lane/sublane-friendly padded sizes. Zero padding is numerically exact:
    # gelu(0) == 0 and zero rows/cols contribute nothing to either matmul.
    M_pad = _round_up(M, row_tile)
    C_in_pad = _round_up(C_in, 128)
    hid_tile = _round_up(min(hid_tile, _round_up(C_hid, 128)), 128)
    C_hid_pad = _round_up(C_hid, hid_tile)
    C_out_pad = _round_up(C_out, 128)

    x2d = jnp.zeros((M_pad, C_in_pad), x.dtype).at[:M, :C_in].set(x.reshape(M, C_in))
    w1p = jnp.zeros((C_in_pad, C_hid_pad), w1.dtype).at[:C_in, :C_hid].set(w1)
    b1p = jnp.zeros((1, C_hid_pad), b1.dtype).at[:, :C_hid].set(b1.reshape(1, C_hid))
    w2p = jnp.zeros((C_hid_pad, C_out_pad), w2.dtype).at[:C_hid, :C_out].set(w2)
    b2p = jnp.zeros((1, C_out_pad), b2.dtype).at[:, :C_out].set(b2.reshape(1, C_out))

    grid = (M_pad // row_tile, C_hid_pad // hid_tile)  # (rows: parallel, hidden: reduction)

    itemsize = jnp.dtype(x.dtype).itemsize
    cost = pl.CostEstimate(
        flops=2 * M_pad * (C_in_pad * C_hid_pad + C_hid_pad * C_out_pad),
        transcendentals=M_pad * C_hid_pad,  # erf per hidden activation
        bytes_accessed=(x2d.size + w1p.size + b1p.size + w2p.size + b2p.size
                        + M_pad * C_out_pad) * itemsize,
    )

    out2d = pl.pallas_call(
        mlp_kernel,
        out_shape=jax.ShapeDtypeStruct((M_pad, C_out_pad), x.dtype),
        grid_spec=pltpu.PrefetchScalarGridSpec(
            num_scalar_prefetch=0,
            grid=grid,
            in_specs=[
                pl.BlockSpec((row_tile, C_in_pad), lambda i, k: (i, 0)),   # x rows
                pl.BlockSpec((C_in_pad, hid_tile), lambda i, k: (0, k)),   # W1 hidden chunk
                pl.BlockSpec((1, hid_tile), lambda i, k: (0, k)),          # b1 hidden chunk
                pl.BlockSpec((hid_tile, C_out_pad), lambda i, k: (k, 0)),  # W2 hidden chunk
                pl.BlockSpec((1, C_out_pad), lambda i, k: (0, 0)),         # b2 (constant)
            ],
            out_specs=pl.BlockSpec((row_tile, C_out_pad), lambda i, k: (i, 0)),
            scratch_shapes=[pltpu.VMEM((row_tile, C_out_pad), jnp.float32)],
        ),
        compiler_params=pltpu.CompilerParams(
            dimension_semantics=("parallel", "arbitrary"),
            vmem_limit_bytes=64 * 1024 * 1024,
        ),
        cost_estimate=cost,
    )(x2d, w1p, b1p, w2p, b2p)

    return out2d[:M, :C_out].reshape(B, N, C_out)


def init_mlp_params(key, in_features, hidden_features, out_features, dtype=jnp.float32):
    """Deterministic init mimicking nn.Linear's uniform(-1/sqrt(fan_in), 1/sqrt(fan_in))."""
    k1, k2, k3, k4 = jax.random.split(key, 4)
    lim1 = 1.0 / math.sqrt(in_features)
    lim2 = 1.0 / math.sqrt(hidden_features)
    w1 = jax.random.uniform(k1, (in_features, hidden_features), dtype, -lim1, lim1)
    b1 = jax.random.uniform(k2, (1, hidden_features), dtype, -lim1, lim1)
    w2 = jax.random.uniform(k3, (hidden_features, out_features), dtype, -lim2, lim2)
    b2 = jax.random.uniform(k4, (1, out_features), dtype, -lim2, lim2)
    return w1, b1, w2, b2


if __name__ == "__main__":
    # Small ViT-like token input: batch=2, tokens=8, in_features=32,
    # hidden_features=64, out_features=32.
    B, N = 2, 8
    in_features, hidden_features, out_features = 32, 64, 32

    key = jax.random.PRNGKey(0)
    kx, kp = jax.random.split(key)
    x = jax.random.normal(kx, (B, N, in_features), jnp.float32)
    w1, b1, w2, b2 = init_mlp_params(kp, in_features, hidden_features, out_features)

    out = mlp_forward(x, w1, b1, w2, b2)
    jax.block_until_ready(out)

    # Reference check in plain JAX (same math path; all-f32 demo -> tight tolerance).
    h_ref = jnp.dot(x, w1) + b1.reshape(-1)
    h_ref = 0.5 * h_ref * (1.0 + lax.erf(h_ref / math.sqrt(2.0)))
    out_ref = jnp.dot(h_ref, w2) + b2.reshape(-1)
    assert out.shape == (B, N, out_features)
    assert jnp.allclose(out, out_ref, atol=1e-5, rtol=1e-5)

    print("KERNEL_OK")
</pallas_src>

<mosaic_0001>
module attributes {stable_mosaic.version = 11 : i64} {
  func.func @mlp_kernel(%arg0: i32, %arg1: i32, %arg2: memref<128x128xf32, #tpu.memory_space<vmem>>, %arg3: memref<128x128xf32, #tpu.memory_space<vmem>>, %arg4: memref<1x128xf32, #tpu.memory_space<vmem>>, %arg5: memref<128x128xf32, #tpu.memory_space<vmem>>, %arg6: memref<1x128xf32, #tpu.memory_space<vmem>>, %arg7: memref<128x128xf32, #tpu.memory_space<vmem>>, %arg8: memref<128x128xf32, #tpu.memory_space<vmem>>) attributes {dimension_semantics = [#tpu.dimension_semantics<parallel>, #tpu.dimension_semantics<arbitrary>], iteration_bounds = array<i64: 1, 1>, scalar_prefetch = 0 : i64, scratch_operands = 1 : i64, tpu.core_type = #tpu.core_type<tc>, window_params = [{transform_indices = @transform_0, window_bounds = array<i64: 128, 128>}, {transform_indices = @transform_1, window_bounds = array<i64: 128, 128>}, {transform_indices = @transform_2, window_bounds = array<i64: 1, 128>}, {transform_indices = @transform_3, window_bounds = array<i64: 128, 128>}, {pipeline_mode = #tpu.pipeline_mode<synchronous>, transform_indices = @transform_4, window_bounds = array<i64: 1, 128>}, {transform_indices = @transform_5, window_bounds = array<i64: 128, 128>}]} {
    %c0_i32 = arith.constant 0 : i32
    %0 = arith.cmpi eq, %arg1, %c0_i32 : i32
    %1 = arith.extui %0 : i1 to i32
    %c0_i32_0 = arith.constant 0 : i32
    %2 = arith.cmpi ne, %1, %c0_i32_0 : i32
    scf.if %2 {
      %cst_18 = arith.constant 0.000000e+00 : f32
      %25 = vector.broadcast %cst_18 : f32 to vector<128x128xf32>
      %c0_19 = arith.constant 0 : index
      %c0_20 = arith.constant 0 : index
      %26 = vector.load %arg8[%c0_19, %c0_20] : memref<128x128xf32, #tpu.memory_space<vmem>>, vector<128x128xf32>
      tpu.vector_store %arg8[%c0_19, %c0_20], %25 {strides = array<i32>} : memref<128x128xf32, #tpu.memory_space<vmem>>, vector<128x128xf32>,
    } else {
    }
    %c0 = arith.constant 0 : index
    %c0_1 = arith.constant 0 : index
    %3 = vector.load %arg2[%c0, %c0_1] : memref<128x128xf32, #tpu.memory_space<vmem>>, vector<128x128xf32>
    %c0_2 = arith.constant 0 : index
    %c0_3 = arith.constant 0 : index
    %4 = vector.load %arg3[%c0_2, %c0_3] : memref<128x128xf32, #tpu.memory_space<vmem>>, vector<128x128xf32>
    %cst = arith.constant dense<0.000000e+00> : vector<128x128xf32>
    %5 = tpu.matmul %3, %4, %cst {dimension_numbers = #tpu.dot_dimension_numbers<[1], [0], [0], [1], [0, 0, 1, 1], [], []>} : vector<128x128xf32>, vector<128x128xf32>, vector<128x128xf32> -> vector<128x128xf32>
    %c0_4 = arith.constant 0 : index
    %c0_5 = arith.constant 0 : index
    %6 = vector.load %arg4[%c0_4, %c0_5] : memref<1x128xf32, #tpu.memory_space<vmem>>, vector<1x128xf32>
    %7 = vector.broadcast %6 : vector<1x128xf32> to vector<128x128xf32>
    %8 = arith.addf %5, %7 : vector<128x128xf32>
    %cst_6 = arith.constant 5.000000e-01 : f32
    %9 = vector.broadcast %cst_6 : f32 to vector<128x128xf32>
    %10 = arith.mulf %9, %8 : vector<128x128xf32>
    %cst_7 = arith.constant 0.707106769 : f32
    %11 = vector.broadcast %cst_7 : f32 to vector<128x128xf32>
    %12 = arith.mulf %8, %11 : vector<128x128xf32>
    %13 = math.erf %12 : vector<128x128xf32>
    %cst_8 = arith.constant 1.000000e+00 : f32
    %14 = vector.broadcast %cst_8 : f32 to vector<128x128xf32>
    %15 = arith.addf %14, %13 : vector<128x128xf32>
    %16 = arith.mulf %10, %15 : vector<128x128xf32>
    %c0_9 = arith.constant 0 : index
    %c0_10 = arith.constant 0 : index
    %17 = vector.load %arg8[%c0_9, %c0_10] : memref<128x128xf32, #tpu.memory_space<vmem>>, vector<128x128xf32>
    %c0_11 = arith.constant 0 : index
    %c0_12 = arith.constant 0 : index
    %18 = vector.load %arg5[%c0_11, %c0_12] : memref<128x128xf32, #tpu.memory_space<vmem>>, vector<128x128xf32>
    %cst_13 = arith.constant dense<0.000000e+00> : vector<128x128xf32>
    %19 = tpu.matmul %16, %18, %cst_13 {dimension_numbers = #tpu.dot_dimension_numbers<[1], [0], [0], [1], [0, 0, 1, 1], [], []>} : vector<128x128xf32>, vector<128x128xf32>, vector<128x128xf32> -> vector<128x128xf32>
    %20 = arith.addf %17, %19 : vector<128x128xf32>
    %c0_14 = arith.constant 0 : index
    %c0_15 = arith.constant 0 : index
    %21 = vector.load %arg8[%c0_14, %c0_15] : memref<128x128xf32, #tpu.memory_space<vmem>>, vector<128x128xf32>
    tpu.vector_store %arg8[%c0_14, %c0_15], %20 {strides = array<i32>} : memref<128x128xf32, #tpu.memory_space<vmem>>, vector<128x128xf32>,
    %c0_i32_16 = arith.constant 0 : i32
    %22 = arith.cmpi eq, %arg1, %c0_i32_16 : i32
    %23 = arith.extui %22 : i1 to i32
    %c0_i32_17 = arith.constant 0 : i32
    %24 = arith.cmpi ne, %23, %c0_i32_17 : i32
    scf.if %24 {
      %c0_18 = arith.constant 0 : index
      %c0_19 = arith.constant 0 : index
      %25 = vector.load %arg8[%c0_18, %c0_19] : memref<128x128xf32, #tpu.memory_space<vmem>>, vector<128x128xf32>
      %c0_20 = arith.constant 0 : index
      %c0_21 = arith.constant 0 : index
      %26 = vector.load %arg6[%c0_20, %c0_21] : memref<1x128xf32, #tpu.memory_space<vmem>>, vector<1x128xf32>
      %27 = vector.broadcast %26 : vector<1x128xf32> to vector<128x128xf32>
      %28 = arith.addf %25, %27 : vector<128x128xf32>
      %c0_22 = arith.constant 0 : index
      %c0_23 = arith.constant 0 : index
      %29 = vector.load %arg7[%c0_22, %c0_23] : memref<128x128xf32, #tpu.memory_space<vmem>>, vector<128x128xf32>
      tpu.vector_store %arg7[%c0_22, %c0_23], %28 {strides = array<i32>} : memref<128x128xf32, #tpu.memory_space<vmem>>, vector<128x128xf32>,
    } else {
    }
    return
  }
  func.func @transform_0(%arg0: i32, %arg1: i32) -> (i32, i32) {
    %c0_i32 = arith.constant 0 : i32
    %c0_i32_0 = arith.constant 0 : i32
    return %arg0, %c0_i32 : i32, i32
  }
  func.func @transform_1(%arg0: i32, %arg1: i32) -> (i32, i32) {
    %c0_i32 = arith.constant 0 : i32
    %c0_i32_0 = arith.constant 0 : i32
    return %c0_i32, %arg1 : i32, i32
  }
  func.func @transform_2(%arg0: i32, %arg1: i32) -> (i32, i32) {
    %c0_i32 = arith.constant 0 : i32
    %c0_i32_0 = arith.constant 0 : i32
    return %c0_i32, %arg1 : i32, i32
  }
  func.func @transform_3(%arg0: i32, %arg1: i32) -> (i32, i32) {
    %c0_i32 = arith.constant 0 : i32
    %c0_i32_0 = arith.constant 0 : i32
    return %arg1, %c0_i32 : i32, i32
  }
  func.func @transform_4(%arg0: i32, %arg1: i32) -> (i32, i32) {
    %c0_i32 = arith.constant 0 : i32
    %c0_i32_0 = arith.constant 0 : i32
    %c0_i32_1 = arith.constant 0 : i32
    return %c0_i32, %c0_i32_0 : i32, i32
  }
  func.func @transform_5(%arg0: i32, %arg1: i32) -> (i32, i32) {
    %c0_i32 = arith.constant 0 : i32
    %c0_i32_0 = arith.constant 0 : i32
    return %arg0, %c0_i32 : i32, i32
  }
}

</mosaic_0001>

<bundles_post_ra>
// kernel: tpu_custom_call.1
= control target key start
LH: loop header
LB: loop body
LE: loop exit
PB: predicated region body
PF: predicated region fallthrough
CT: control target
= control target key end

     0   :  { %10 = vsyncpa [#allocation4], 0  ;;  %s1236_s0 = inlined_call_operand.hbm [shape: f32[128,128], index: 0, kind: input, shape index: {}]   ;;  %s1237_s1 = inlined_call_operand.hbm [shape: f32[128,128], index: 1, kind: input, shape index: {}]   ;;  %s1238_s2 = inlined_call_operand.hbm [shape: f32[1,128], index: 2, kind: input, shape index: {}]   ;;  %s1239_s3 = inlined_call_operand.hbm [shape: f32[128,128], index: 3, kind: input, shape index: {}]   ;;  %s1240_s4 = inlined_call_operand.hbm [shape: f32[1,128], index: 4, kind: input, shape index: {}]   ;;  %s1241_s5 = inlined_call_operand.hbm [shape: f32[128,128], index: 5, kind: output, shape index: {}]  }
   0x1   :  { %11 = vsyncpa [#allocation7], 0 }
   0x2   :  { %12 = vsyncpa [#allocation10], 0 }
   0x3   :  { %13 = vsyncpa [#allocation5], 0  ;;  %s1077_s18 = smov [#allocation6]   ;;  %s1078_s20 = smov [#allocation9]  }
   0x4   :  { %s31_s19 = sshll.u32 %s1077_s18, 4  ;;  %s53_s21 = sshll.u32 %s1078_s20, 4  ;;  %s32_s19 = int_to_ptr.vmem [resolvable:$true] %s31_s19  ;;  %s1115_s21 = int_to_ptr.vmem [resolvable:$true] %s53_s21 }
   0x5   :  { %s937_s24 = scalar_lea.hbm %s1237_s1, 2048 }
   0x6   :  { %p938_p0 = scmp.ne.s32.totalorder %s1237_s1, %s937_s24  ;;  %p941_p1 = scmp.lt.u32.totalorder %s937_s24, %s1237_s1 }
   0x8   :  { %p943_p2 = pnand %p941_p1, %p938_p0 }
   0xa   :  { %946 = shalt.err (!%p943_p2)
}
   0xb   :  { %s947_s29 = scalar_lea.vmem %s32_s19, 2048  ;;  %p952_p4 = scmp.lt.s32.totalorder %s32_s19, %s32_s19 }
   0xc   :  { %p948_p3 = scmp.ne.s32.totalorder %s32_s19, %s947_s29  ;;  %p953_p5 = scmp.lt.s32.totalorder %s947_s29, %s947_s29 }
   0xe   :  { %p954_p6 = por %p953_p5, %p952_p4 }
  0x10   :  { %p955_p7 = pnand %p954_p6, %p948_p3 }
  0x12   :  { %958 = shalt.err (!%p955_p7)
}
  0x13   :  { %s1079_s30 = smov 128   ;;  %s1080_s6 = smov 8  }
  0x14   :  { %37 = dma.hbm_to_vmem [thread:$0]  %s1237_s1, 2048, %s32_s19, [#allocation7], %s1079_s30, %s1079_s30, %s1080_s6  }
  0x15   :  { %s959_s11 = scalar_lea.hbm %s1239_s3, 2048 }
  0x16   :  { %p960_p8 = scmp.ne.s32.totalorder %s1239_s3, %s959_s11  ;;  %p963_p9 = scmp.lt.u32.totalorder %s959_s11, %s1239_s3 }
  0x18   :  { %p965_p10 = pnand %p963_p9, %p960_p8 }
  0x1a   :  { %968 = shalt.err (!%p965_p10)
}
  0x1b   :  { %s969_s16 = scalar_lea.vmem %s1115_s21, 2048  ;;  %p974_p12 = scmp.lt.s32.totalorder %s1115_s21, %s1115_s21 }
  0x1c   :  { %p970_p11 = scmp.ne.s32.totalorder %s1115_s21, %s969_s16  ;;  %p975_p13 = scmp.lt.s32.totalorder %s969_s16, %s969_s16 }
  0x1e   :  { %p976_p0 = por %p975_p13, %p974_p12 }
  0x20   :  { %p977_p1 = pnand %p976_p0, %p970_p11 }
  0x22   :  { %980 = shalt.err (!%p977_p1)
}
  0x23   :  { %59 = dma.hbm_to_vmem [thread:$0]  %s1239_s3, 2048, %s1115_s21, [#allocation10], %s1079_s30, %s1079_s30, %s1080_s6  }
  0x24   :  { %s1081_s18 = smov [#allocation3]   ;;  %s1082_s20 = smov [#allocation8]  }
  0x25   :  { %s19_s19 = sshll.u32 %s1081_s18, 4  ;;  %s44_s22 = sshll.u32 %s1082_s20, 4  ;;  %s20_s19 = int_to_ptr.vmem [resolvable:$true] %s19_s19  ;;  %s45_s22 = int_to_ptr.vmem [resolvable:$true] %s44_s22 }
  0x26   :  { %s981_s25 = scalar_lea.hbm %s1236_s0, 2048 }
  0x27   :  { %p982_p2 = scmp.ne.s32.totalorder %s1236_s0, %s981_s25  ;;  %p985_p3 = scmp.lt.u32.totalorder %s981_s25, %s1236_s0 }
  0x29   :  { %p987_p4 = pnand %p985_p3, %p982_p2 }
  0x2b   :  { %990 = shalt.err (!%p987_p4)
}
  0x2c   :  { %s991_s3 = scalar_lea.vmem %s20_s19, 2048  ;;  %p996_p6 = scmp.lt.s32.totalorder %s20_s19, %s20_s19 }
  0x2d   :  { %p992_p5 = scmp.ne.s32.totalorder %s20_s19, %s991_s3  ;;  %p997_p7 = scmp.lt.s32.totalorder %s991_s3, %s991_s3 }
  0x2f   :  { %p998_p8 = por %p997_p7, %p996_p6 }
  0x31   :  { %p999_p9 = pnand %p998_p8, %p992_p5 }
  0x33   :  { %1002 = shalt.err (!%p999_p9)
}
  0x34   :  { %25 = dma.hbm_to_vmem [thread:$0]  %s1236_s0, 2048, %s20_s19, [#allocation4], %s1079_s30, %s1079_s30, %s1080_s6  }
  0x35   :  { %s1003_s10 = scalar_lea.hbm %s1238_s2, 16 }
  0x36   :  { %p1004_p10 = scmp.ne.s32.totalorder %s1238_s2, %s1003_s10  ;;  %p1007_p11 = scmp.lt.u32.totalorder %s1003_s10, %s1238_s2 }
  0x38   :  { %p1009_p12 = pnand %p1007_p11, %p1004_p10 }
  0x3a   :  { %1012 = shalt.err (!%p1009_p12)
}
  0x3b   :  { %s1013_s15 = scalar_lea.vmem %s45_s22, 16  ;;  %s1017_s16 = scalar_lea.vmem %s45_s22, 32 }
  0x3c   :  { %p1014_p13 = scmp.ne.s32.totalorder %s45_s22, %s1013_s15  ;;  %p1018_p0 = scmp.lt.s32.totalorder %s45_s22, %s45_s22 }
  0x3d   :  { %p1019_p1 = scmp.lt.s32.totalorder %s1017_s16, %s1013_s15 }
  0x3f   :  { %p1020_p2 = por %p1019_p1, %p1018_p0 }
  0x41   :  { %p1021_p3 = pnand %p1020_p2, %p1014_p13 }
  0x43   :  { %1024 = shalt.err (!%p1021_p3)
}
  0x44   :  { %47 = dma.hbm_to_vmem [thread:$0]  %s1238_s2, 16, %s45_s22, [#allocation7]  }
  0x45   :  { %s1083_s17 = smov [#allocation11]   ;;  %s1025_s23 = scalar_lea.hbm %s1240_s4, 16 }
  0x46   :  { %s66_s18 = sshll.u32 %s1083_s17, 4  ;;  %p1026_p4 = scmp.ne.s32.totalorder %s1240_s4, %s1025_s23  ;;  %s67_s18 = int_to_ptr.vmem [resolvable:$true] %s66_s18 }
  0x47   :  { %p1029_p5 = scmp.lt.u32.totalorder %s1025_s23, %s1240_s4 }
  0x49   :  { %p1031_p6 = pnand %p1029_p5, %p1026_p4 }
  0x4b   :  { %1034 = shalt.err (!%p1031_p6)
}
  0x4c   :  { %s1035_s28 = scalar_lea.vmem %s67_s18, 16  ;;  %s1039_s2 = scalar_lea.vmem %s67_s18, 32 }
  0x4d   :  { %p1036_p7 = scmp.ne.s32.totalorder %s67_s18, %s1035_s28  ;;  %p1040_p8 = scmp.lt.s32.totalorder %s67_s18, %s67_s18 }
  0x4e   :  { %p1041_p9 = scmp.lt.s32.totalorder %s1039_s2, %s1035_s28 }
  0x50   :  { %p1042_p10 = por %p1041_p9, %p1040_p8 }
  0x52   :  { %p1043_p11 = pnand %p1042_p10, %p1036_p7 }
  0x54   :  { %1046 = shalt.err (!%p1043_p11)
}
  0x55   :  { %69 = dma.hbm_to_vmem [thread:$0]  %s1240_s4, 16, %s67_s18, [#allocation10]  }
  0x56   :  { %1069 = dma.done.wait [#allocation4], 2048  }
  0x57   :  { %1070 = vsyncadd [#allocation4], 4294965248 }
  0x58   :  { %1071 = dma.done.wait [#allocation7], 2064  }
  0x59   :  { %1072 = vsyncadd [#allocation7], 4294965232 }
  0x5a   :  { %1073 = dma.done.wait [#allocation10], 2064  }
  0x5b   :  { %1074 = vsyncadd [#allocation10], 4294965232  ;;  %v121_v0 = vld [vmem:[#allocation6] sm:$0xff]  ;;  %v122_v1 = vld [vmem:[#allocation6 + $0x8] sm:$0xff]  ;;  %s1084_s4 = smov [#allocation12]  }
  0x5c   :  { %v123_v2 = vld [vmem:[#allocation6 + $0x10] sm:$0xff]  ;;  %v833_v3 = vpack.c.bf16 %v122_v1, %v121_v0  ;;  %v124_v4 = vld [vmem:[#allocation6 + $0x18] sm:$0xff]  ;;  %v125_v6 = vld [vmem:[#allocation6 + $0x20] sm:$0xff]  ;;  %s641_s3 = sshll.u32 %s1084_s4, 4  ;;  %s642_s3 = int_to_ptr.vmem [resolvable:$true] %s641_s3 }
  0x5d   :  { %v837_v5 = vpack.c.bf16 %v124_v4, %v123_v2  ;;  %v126_v7 = vld [vmem:[#allocation6 + $0x28] sm:$0xff]  ;;  %v105_v9 = vld [vmem:[#allocation3] sm:$0xff]  ;;  %v127_v10 = vld [vmem:[#allocation6 + $0x30] sm:$0xff]  ;;  %s1047_s21 = scalar_lea.vmem %s642_s3, 2048  ;;  %p1052_p13 = scmp.lt.s32.totalorder %s642_s3, %s642_s3 }
  0x5e   :  { %834 = vmatprep.subr.bf16.mxu0 %v833_v3  ;;  %v841_v8 = vpack.c.bf16 %v126_v7, %v125_v6  ;;  %v128_v11 = vld [vmem:[#allocation6 + $0x38] sm:$0xff]  ;;  %753 = vmatprep.mubr.f32.mxu0 %v105_v9  ;;  %v129_v13 = vld [vmem:[#allocation6 + $0x40] sm:$0xff]  ;;  %v130_v14 = vld [vmem:[#allocation6 + $0x48] sm:$0xff]  ;;  %p1048_p12 = scmp.ne.s32.totalorder %s642_s3, %s1047_s21  ;;  %p1053_p0 = scmp.lt.s32.totalorder %s1047_s21, %s1047_s21 }
  0x5f   :  { %836 = vmatpush3.bf16.msra.mxu0 %v833_v3  ;;  %v845_v12 = vpack.c.bf16 %v128_v11, %v127_v10  ;;  %v385_v15 = vld [vmem:[#allocation9] sm:$0xff]  ;;  %v386_v16 = vld [vmem:[#allocation9 + $0x8] sm:$0xff]  ;;  %v387_v17 = vld [vmem:[#allocation9 + $0x10] sm:$0xff]  ;;  %v849_v21 = vpack.c.bf16 %v130_v14, %v129_v13 }
  0x60   :  { %838 = vmatprep.subr.bf16.mxu0 %v837_v5  ;;  %v388_v18 = vld [vmem:[#allocation9 + $0x18] sm:$0xff]  ;;  %v865_v19 = vpack.c.bf16 %v386_v16, %v385_v15  ;;  %v389_v22 = vld [vmem:[#allocation9 + $0x20] sm:$0xff]  ;;  %v390_v23 = vld [vmem:[#allocation9 + $0x28] sm:$0xff]  ;;  %p1054_p1 = por %p1053_p0, %p1052_p13 }
  0x61   :  { %v869_v20 = vpack.c.bf16 %v388_v18, %v387_v17  ;;  %v131_v24 = vld [vmem:[#allocation6 + $0x50] sm:$0xff]  ;;  %v132_v25 = vld [vmem:[#allocation6 + $0x58] sm:$0xff]  ;;  %v873_v26 = vpack.c.bf16 %v390_v23, %v389_v22  ;;  %v133_v28 = vld [vmem:[#allocation6 + $0x60] sm:$0xff] }
  0x62   :  { %866 = vmatprep.subr.bf16.mxu1 %v865_v19  ;;  %v853_v27 = vpack.c.bf16 %v132_v25, %v131_v24  ;;  %v134_v29 = vld [vmem:[#allocation6 + $0x68] sm:$0xff]  ;;  %v135_v31 = vld [vmem:[#allocation6 + $0x70] sm:$0xff]  ;;  %v136_v32 = vld [vmem:[#allocation6 + $0x78] sm:$0xff]  ;;  %p1055_p2 = pnand %p1054_p1, %p1048_p12 }
  0x63   :  { %840 = vmatpush3.bf16.msra.mxu0 %v837_v5  ;;  %868 = vmatpush3.bf16.msra.mxu1 %v865_v19  ;;  %v857_v30 = vpack.c.bf16 %v134_v29, %v133_v28  ;;  %v861_v33 = vpack.c.bf16 %v136_v32, %v135_v31  ;;  %v106_v34 = vld [vmem:[#allocation3 + $0x8] sm:$0xff]  ;;  %v107_v35 = vld [vmem:[#allocation3 + $0x10] sm:$0xff]  ;;  %v108_v36 = vld [vmem:[#allocation3 + $0x18] sm:$0xff] }
  0x64   :  { %842 = vmatprep.subr.bf16.mxu0 %v841_v8  ;;  %870 = vmatprep.subr.bf16.mxu1 %v869_v20  ;;  %v109_v37 = vld [vmem:[#allocation3 + $0x20] sm:$0xff]  ;;  %v110_v38 = vld [vmem:[#allocation3 + $0x28] sm:$0xff]  ;;  %v111_v39 = vld [vmem:[#allocation3 + $0x30] sm:$0xff] }
  0x65   :  { %v112_v40 = vld [vmem:[#allocation3 + $0x38] sm:$0xff]  ;;  %v113_v41 = vld [vmem:[#allocation3 + $0x40] sm:$0xff]  ;;  %v114_v42 = vld [vmem:[#allocation3 + $0x48] sm:$0xff] }
  0x66   :  { %v115_v43 = vld [vmem:[#allocation3 + $0x50] sm:$0xff]  ;;  %v116_v44 = vld [vmem:[#allocation3 + $0x58] sm:$0xff]  ;;  %v117_v45 = vld [vmem:[#allocation3 + $0x60] sm:$0xff] }
  0x67   :  { %844 = vmatpush3.bf16.msra.mxu0 %v841_v8  ;;  %872 = vmatpush3.bf16.msra.mxu1 %v869_v20  ;;  %v118_v46 = vld [vmem:[#allocation3 + $0x68] sm:$0xff]  ;;  %v119_v47 = vld [vmem:[#allocation3 + $0x70] sm:$0xff]  ;;  %v120_v48 = vld [vmem:[#allocation3 + $0x78] sm:$0xff] }
  0x68   :  { %846 = vmatprep.subr.bf16.mxu0 %v845_v12  ;;  %874 = vmatprep.subr.bf16.mxu1 %v873_v26  ;;  %v391_v49 = vld [vmem:[#allocation9 + $0x30] sm:$0xff]  ;;  %v392_v50 = vld [vmem:[#allocation9 + $0x38] sm:$0xff]  ;;  %v393_v52 = vld [vmem:[#allocation9 + $0x40] sm:$0xff] }
  0x69   :  { %v877_v51 = vpack.c.bf16 %v392_v50, %v391_v49  ;;  %v394_v53 = vld [vmem:[#allocation9 + $0x48] sm:$0xff]  ;;  %v395_v55 = vld [vmem:[#allocation9 + $0x50] sm:$0xff]  ;;  %v396_v56 = vld [vmem:[#allocation9 + $0x58] sm:$0xff] }
  0x6a   :  { %v881_v54 = vpack.c.bf16 %v394_v53, %v393_v52  ;;  %v885_v57 = vpack.c.bf16 %v396_v56, %v395_v55  ;;  %v397_v58 = vld [vmem:[#allocation9 + $0x60] sm:$0xff]  ;;  %v398_v59 = vld [vmem:[#allocation9 + $0x68] sm:$0xff]  ;;  %v399_v61 = vld [vmem:[#allocation9 + $0x70] sm:$0xff] }
  0x6b   :  { %848 = vmatpush3.bf16.msra.mxu0 %v845_v12  ;;  %876 = vmatpush3.bf16.msra.mxu1 %v873_v26  ;;  %v889_v60 = vpack.c.bf16 %v398_v59, %v397_v58  ;;  %v400_v62 = vld [vmem:[#allocation9 + $0x78] sm:$0xff] }
  0x6c   :  { %850 = vmatprep.subr.bf16.mxu0 %v849_v21  ;;  %878 = vmatprep.subr.bf16.mxu1 %v877_v51  ;;  %v893_v63 = vpack.c.bf16 %v400_v62, %v399_v61  ;;  %v1191_v0 = vld [vmem:[#allocation8] ss:$0 sm:$0xff] }
  0x6f   :  { %852 = vmatpush3.bf16.msra.mxu0 %v849_v21  ;;  %880 = vmatpush3.bf16.msra.mxu1 %v877_v51 }
  0x70   :  { %854 = vmatprep.subr.bf16.mxu0 %v853_v27  ;;  %882 = vmatprep.subr.bf16.mxu1 %v881_v54 }
  0x73   :  { %856 = vmatpush3.bf16.msra.mxu0 %v853_v27  ;;  %884 = vmatpush3.bf16.msra.mxu1 %v881_v54 }
  0x74   :  { %858 = vmatprep.subr.bf16.mxu0 %v857_v30  ;;  %886 = vmatprep.subr.bf16.mxu1 %v885_v57 }
  0x77   :  { %860 = vmatpush3.bf16.msra.mxu0 %v857_v30  ;;  %888 = vmatpush3.bf16.msra.mxu1 %v885_v57 }
  0x78   :  { %862 = vmatprep.subr.bf16.mxu0 %v861_v33  ;;  %890 = vmatprep.subr.bf16.mxu1 %v889_v60 }
  0x7b   :  { %864 = vmatpush3.bf16.msra.mxu0 %v861_v33  ;;  %892 = vmatpush3.bf16.msra.mxu1 %v889_v60 }
  0x7c   :  { %894 = vmatprep.subr.bf16.mxu1 %v893_v63 }
  0x7e   :  { %754 = vmatmul.mubr.f32.vlgmr.msra.gmra.mrb[0].mxu0 %v106_v34 }
  0x7f   :  { %756 = vmatprep.mubr.f32.mxu0 %v107_v35  ;;  %896 = vmatpush3.bf16.msra.mxu1 %v893_v63 }
  0x82   :  { %757 = vmatmul.mubr.f32.gmra.mrb[2].mxu0 %v108_v36 }
  0x83   :  { %759 = vmatprep.mubr.f32.mxu0 %v109_v37 }
  0x86   :  { %760 = vmatmul.mubr.f32.gmra.mrb[4].mxu0 %v110_v38 }
  0x87   :  { %762 = vmatprep.mubr.f32.mxu0 %v111_v39 }
  0x8a   :  { %763 = vmatmul.mubr.f32.gmra.mrb[6].mxu0 %v112_v40 }
  0x8b   :  { %765 = vmatprep.mubr.f32.mxu0 %v113_v41 }
  0x8e   :  { %766 = vmatmul.mubr.f32.gmra.mrb[8].mxu0 %v114_v42 }
  0x8f   :  { %768 = vmatprep.mubr.f32.mxu0 %v115_v43 }
  0x92   :  { %769 = vmatmul.mubr.f32.gmra.mrb[10].mxu0 %v116_v44 }
  0x93   :  { %771 = vmatprep.mubr.f32.mxu0 %v117_v45 }
  0x96   :  { %772 = vmatmul.mubr.f32.gmra.mrb[12].mxu0 %v118_v46 }
  0x97   :  { %774 = vmatprep.mubr.f32.mxu0 %v119_v47 }
  0x9a   :  { %775 = vmatmul.mubr.f32.gmra.mrb[14].mxu0 %v120_v48 }
 0x151   :  { %v755_v1 = vpop.f32.mrb[0].mxu0 }
 0x152   :  { %v216_v2 = vadd.f32 %v755_v1, %v1191_v0  ;;  %v210_v3 = vpop.f32.mrb[1].mxu0 }
 0x153   :  { %v211_v4 = vadd.f32 %v1191_v0, %v210_v3 }
 0x154   :  { %v306_v5 = vmul.f32 0.70710677, %v216_v2  ;;  %v290_v33 = vmul.f32 0.5, %v216_v2 }
 0x155   :  { %v305_v6 = vmul.f32 0.70710677, %v211_v4  ;;  %v758_v7 = vpop.f32.mrb[2].mxu0  ;;  %v289_v31 = vmul.f32 0.5, %v211_v4 }
 0x156   :  { %905 = verf.f32 %v306_v5  ;;  %v226_v8 = vadd.f32 %v758_v7, %v1191_v0  ;;  %v220_v9 = vpop.f32.mrb[3].mxu0 }
 0x157   :  { %907 = verf.f32 %v305_v6  ;;  %v221_v10 = vadd.f32 %v1191_v0, %v220_v9 }
 0x158   :  { %v308_v11 = vmul.f32 0.70710677, %v226_v8  ;;  %v292_v47 = vmul.f32 0.5, %v226_v8 }
 0x159   :  { %v307_v12 = vmul.f32 0.70710677, %v221_v10  ;;  %v761_v13 = vpop.f32.mrb[4].mxu0  ;;  %v291_v43 = vmul.f32 0.5, %v221_v10 }
 0x15a   :  { %909 = verf.f32 %v308_v11  ;;  %v236_v14 = vadd.f32 %v761_v13, %v1191_v0  ;;  %v230_v15 = vpop.f32.mrb[5].mxu0 }
 0x15b   :  { %911 = verf.f32 %v307_v12  ;;  %v231_v16 = vadd.f32 %v1191_v0, %v230_v15 }
 0x15c   :  { %v310_v17 = vmul.f32 0.70710677, %v236_v14  ;;  %v294_v61 = vmul.f32 0.5, %v236_v14 }
 0x15d   :  { %v309_v18 = vmul.f32 0.70710677, %v231_v16  ;;  %v764_v19 = vpop.f32.mrb[6].mxu0  ;;  %v293_v57 = vmul.f32 0.5, %v231_v16 }
 0x15e   :  { %913 = verf.f32 %v310_v17  ;;  %v1200_v20 = vadd.f32 %v764_v19, %v1191_v0  ;;  %v240_v21 = vpop.f32.mrb[7].mxu0 }
 0x15f   :  { %915 = verf.f32 %v309_v18  ;;  %v241_v22 = vadd.f32 %v1191_v0, %v240_v21 }
 0x160   :  { %v906_v23 = vpop.eup %905  ;;  %v312_v24 = vmul.f32 0.70710677, %v1200_v20  ;;  %v296_v12 = vmul.f32 0.5, %v1200_v20 }
 0x161   :  { %v908_v25 = vpop.eup %907  ;;  %v338_v26 = vadd.f32 1.0, %v906_v23  ;;  %v311_v27 = vmul.f32 0.70710677, %v241_v22  ;;  %v767_v28 = vpop.f32.mrb[8].mxu0  ;;  %v295_v8 = vmul.f32 0.5, %v241_v22 }
 0x162   :  { %917 = verf.f32 %v312_v24  ;;  %v1205_v29 = vadd.f32 %v767_v28, %v1191_v0  ;;  %v250_v30 = vpop.f32.mrb[9].mxu0  ;;  %v337_v32 = vadd.f32 1.0, %v908_v25 }
 0x163   :  { %919 = verf.f32 %v311_v27  ;;  %v251_v34 = vadd.f32 %v1191_v0, %v250_v30  ;;  %v354_v42 = vmul.f32 %v338_v26, %v290_v33 }
 0x164   :  { %v910_v35 = vpop.eup %909  ;;  %v314_v36 = vmul.f32 0.70710677, %v1205_v29  ;;  %v353_v37 = vmul.f32 %v337_v32, %v289_v31  ;;  %v298_v24 = vmul.f32 0.5, %v1205_v29 }
 0x165   :  { %v912_v38 = vpop.eup %911  ;;  %v340_v39 = vadd.f32 1.0, %v910_v35  ;;  %v313_v40 = vmul.f32 0.70710677, %v251_v34  ;;  %v770_v41 = vpop.f32.mrb[10].mxu0  ;;  %v297_v22 = vmul.f32 0.5, %v251_v34 }
 0x166   :  { %v339_v44 = vadd.f32 1.0, %v912_v38  ;;  %921 = verf.f32 %v314_v36  ;;  %v1210_v45 = vadd.f32 %v770_v41, %v1191_v0  ;;  %v260_v46 = vpop.f32.mrb[11].mxu0  ;;  %809 = vmatprep.mubr.f32.mxu1 %v353_v37 }
 0x167   :  { %923 = verf.f32 %v313_v40  ;;  %v261_v48 = vadd.f32 %v1191_v0, %v260_v46  ;;  %810 = vmatmul.mubr.f32.vlgmr.msra.gmra.mrb[0].mxu1 %v354_v42  ;;  %v356_v56 = vmul.f32 %v340_v39, %v292_v47 }
 0x168   :  { %v914_v49 = vpop.eup %913  ;;  %v316_v50 = vmul.f32 0.70710677, %v1210_v45  ;;  %v355_v51 = vmul.f32 %v339_v44, %v291_v43  ;;  %v300_v31 = vmul.f32 0.5, %v1210_v45 }
 0x169   :  { %v916_v52 = vpop.eup %915  ;;  %v342_v53 = vadd.f32 1.0, %v914_v49  ;;  %v315_v54 = vmul.f32 0.70710677, %v261_v48  ;;  %v773_v55 = vpop.f32.mrb[12].mxu0  ;;  %v299_v28 = vmul.f32 0.5, %v261_v48 }
 0x16a   :  { %v341_v58 = vadd.f32 1.0, %v916_v52  ;;  %925 = verf.f32 %v316_v50  ;;  %v276_v59 = vadd.f32 %v773_v55, %v1191_v0  ;;  %v270_v60 = vpop.f32.mrb[13].mxu0  ;;  %812 = vmatprep.mubr.f32.mxu1 %v355_v51  ;;  %v656_v49 = vld [vmem:[#allocation11] ss:$0 sm:$0xff] }
 0x16b   :  { %927 = verf.f32 %v315_v54  ;;  %v271_v62 = vadd.f32 %v1191_v0, %v270_v60  ;;  %813 = vmatmul.mubr.f32.gmra.mrb[2].mxu1 %v356_v56  ;;  %v358_v7 = vmul.f32 %v342_v53, %v294_v61 }
 0x16c   :  { %v918_v63 = vpop.eup %917  ;;  %v318_v1 = vmul.f32 0.70710677, %v276_v59  ;;  %v357_v2 = vmul.f32 %v341_v58, %v293_v57  ;;  %v302_v38 = vmul.f32 0.5, %v276_v59 }
 0x16d   :  { %v920_v3 = vpop.eup %919  ;;  %v344_v4 = vadd.f32 1.0, %v918_v63  ;;  %v317_v5 = vmul.f32 0.70710677, %v271_v62  ;;  %v776_v6 = vpop.f32.mrb[14].mxu0  ;;  %v301_v37 = vmul.f32 0.5, %v271_v62 }
 0x16e   :  { %v343_v9 = vadd.f32 1.0, %v920_v3  ;;  %929 = verf.f32 %v318_v1  ;;  %v286_v10 = vadd.f32 %v776_v6, %v1191_v0  ;;  %v280_v11 = vpop.f32.mrb[15].mxu0  ;;  %815 = vmatprep.mubr.f32.mxu1 %v357_v2 }
 0x16f   :  { %931 = verf.f32 %v317_v5  ;;  %v281_v13 = vadd.f32 %v1191_v0, %v280_v11  ;;  %816 = vmatmul.mubr.f32.gmra.mrb[4].mxu1 %v358_v7  ;;  %v360_v21 = vmul.f32 %v344_v4, %v296_v12 }
 0x170   :  { %v922_v14 = vpop.eup %921  ;;  %v320_v15 = vmul.f32 0.70710677, %v286_v10  ;;  %v359_v16 = vmul.f32 %v343_v9, %v295_v8  ;;  %v304_v45 = vmul.f32 0.5, %v286_v10 }
 0x171   :  { %v924_v17 = vpop.eup %923  ;;  %v346_v18 = vadd.f32 1.0, %v922_v14  ;;  %v319_v19 = vmul.f32 0.70710677, %v281_v13  ;;  %v303_v44 = vmul.f32 0.5, %v281_v13 }
 0x172   :  { %v345_v23 = vadd.f32 1.0, %v924_v17  ;;  %933 = verf.f32 %v320_v15  ;;  %818 = vmatprep.mubr.f32.mxu1 %v359_v16 }
 0x173   :  { %935 = verf.f32 %v319_v19  ;;  %819 = vmatmul.mubr.f32.gmra.mrb[6].mxu1 %v360_v21  ;;  %v362_v27 = vmul.f32 %v346_v18, %v298_v24 }
 0x174   :  { %v926_v20 = vpop.eup %925  ;;  %v361_v25 = vmul.f32 %v345_v23, %v297_v22 }
 0x175   :  { %v928_v26 = vpop.eup %927  ;;  %v348_v0 = vadd.f32 1.0, %v926_v20 }
 0x176   :  { %v347_v30 = vadd.f32 1.0, %v928_v26  ;;  %821 = vmatprep.mubr.f32.mxu1 %v361_v25 }
 0x177   :  { %822 = vmatmul.mubr.f32.gmra.mrb[8].mxu1 %v362_v27  ;;  %v364_v36 = vmul.f32 %v348_v0, %v300_v31 }
 0x178   :  { %v930_v32 = vpop.eup %929  ;;  %v363_v33 = vmul.f32 %v347_v30, %v299_v28 }
 0x179   :  { %v932_v34 = vpop.eup %931  ;;  %v350_v35 = vadd.f32 1.0, %v930_v32 }
 0x17a   :  { %v349_v29 = vadd.f32 1.0, %v932_v34  ;;  %824 = vmatprep.mubr.f32.mxu1 %v363_v33 }
 0x17b   :  { %825 = vmatmul.mubr.f32.gmra.mrb[10].mxu1 %v364_v36  ;;  %v366_v43 = vmul.f32 %v350_v35, %v302_v38 }
 0x17c   :  { %v934_v39 = vpop.eup %933  ;;  %v365_v40 = vmul.f32 %v349_v29, %v301_v37 }
 0x17d   :  { %v936_v41 = vpop.eup %935  ;;  %v352_v42 = vadd.f32 1.0, %v934_v39 }
 0x17e   :  { %v351_v46 = vadd.f32 1.0, %v936_v41  ;;  %827 = vmatprep.mubr.f32.mxu1 %v365_v40 }
 0x17f   :  { %828 = vmatmul.mubr.f32.gmra.mrb[12].mxu1 %v366_v43  ;;  %v368_v48 = vmul.f32 %v352_v42, %v304_v45 }
 0x180   :  { %v367_v47 = vmul.f32 %v351_v46, %v303_v44 }
 0x182   :  { %830 = vmatprep.mubr.f32.mxu1 %v367_v47 }
 0x183   :  { %831 = vmatmul.mubr.f32.gmra.mrb[14].mxu1 %v368_v48 }
 0x23a   :  { %v811_v50 = vpop.f32.mrb[0].mxu1 }
 0x23b   :  { %v605_v51 = vadd.f32 %v811_v50, %v656_v49  ;;  %v467_v52 = vpop.f32.mrb[1].mxu1 }
 0x23c   :  { %v604_v53 = vadd.f32 %v656_v49, %v467_v52 }
 0x23d   :  { %621 = vst [vmem:[#allocation12 + $0x8] sm:$0xff] %v605_v51 }
 0x23e   :  { %620 = vst [vmem:[#allocation12] sm:$0xff] %v604_v53  ;;  %v814_v54 = vpop.f32.mrb[2].mxu1 }
 0x23f   :  { %v607_v55 = vadd.f32 %v814_v54, %v656_v49  ;;  %v477_v56 = vpop.f32.mrb[3].mxu1 }
 0x240   :  { %v606_v57 = vadd.f32 %v656_v49, %v477_v56 }
 0x241   :  { %623 = vst [vmem:[#allocation12 + $0x18] sm:$0xff] %v607_v55 }
 0x242   :  { %622 = vst [vmem:[#allocation12 + $0x10] sm:$0xff] %v606_v57  ;;  %v817_v58 = vpop.f32.mrb[4].mxu1 }
 0x243   :  { %v609_v59 = vadd.f32 %v817_v58, %v656_v49  ;;  %v487_v60 = vpop.f32.mrb[5].mxu1 }
 0x244   :  { %v608_v61 = vadd.f32 %v656_v49, %v487_v60 }
 0x245   :  { %625 = vst [vmem:[#allocation12 + $0x28] sm:$0xff] %v609_v59 }
 0x246   :  { %624 = vst [vmem:[#allocation12 + $0x20] sm:$0xff] %v608_v61  ;;  %v820_v62 = vpop.f32.mrb[6].mxu1 }
 0x247   :  { %v611_v63 = vadd.f32 %v820_v62, %v656_v49  ;;  %v497_v1 = vpop.f32.mrb[7].mxu1 }
 0x248   :  { %v610_v2 = vadd.f32 %v656_v49, %v497_v1 }
 0x249   :  { %627 = vst [vmem:[#allocation12 + $0x38] sm:$0xff] %v611_v63 }
 0x24a   :  { %626 = vst [vmem:[#allocation12 + $0x30] sm:$0xff] %v610_v2  ;;  %v823_v3 = vpop.f32.mrb[8].mxu1 }
 0x24b   :  { %v613_v4 = vadd.f32 %v823_v3, %v656_v49  ;;  %v507_v5 = vpop.f32.mrb[9].mxu1 }
 0x24c   :  { %v612_v6 = vadd.f32 %v656_v49, %v507_v5 }
 0x24d   :  { %629 = vst [vmem:[#allocation12 + $0x48] sm:$0xff] %v613_v4 }
 0x24e   :  { %628 = vst [vmem:[#allocation12 + $0x40] sm:$0xff] %v612_v6  ;;  %v826_v7 = vpop.f32.mrb[10].mxu1 }
 0x24f   :  { %v615_v8 = vadd.f32 %v826_v7, %v656_v49  ;;  %v517_v9 = vpop.f32.mrb[11].mxu1 }
 0x250   :  { %v614_v10 = vadd.f32 %v656_v49, %v517_v9 }
 0x251   :  { %631 = vst [vmem:[#allocation12 + $0x58] sm:$0xff] %v615_v8 }
 0x252   :  { %630 = vst [vmem:[#allocation12 + $0x50] sm:$0xff] %v614_v10  ;;  %v829_v11 = vpop.f32.mrb[12].mxu1 }
 0x253   :  { %v617_v12 = vadd.f32 %v829_v11, %v656_v49  ;;  %v527_v13 = vpop.f32.mrb[13].mxu1 }
 0x254   :  { %v616_v14 = vadd.f32 %v656_v49, %v527_v13 }
 0x255   :  { %633 = vst [vmem:[#allocation12 + $0x68] sm:$0xff] %v617_v12 }
 0x256   :  { %632 = vst [vmem:[#allocation12 + $0x60] sm:$0xff] %v616_v14  ;;  %v832_v15 = vpop.f32.mrb[14].mxu1 }
 0x257   :  { %v619_v16 = vadd.f32 %v832_v15, %v656_v49  ;;  %v537_v17 = vpop.f32.mrb[15].mxu1 }
 0x258   :  { %v618_v18 = vadd.f32 %v656_v49, %v537_v17 }
 0x259   :  { %635 = vst [vmem:[#allocation12 + $0x78] sm:$0xff] %v619_v16 }
 0x25a   :  { %634 = vst [vmem:[#allocation12 + $0x70] sm:$0xff] %v618_v18 }
 0x25b   :  { %1058 = shalt.err (!%p1055_p2)
}
 0x25c   :  { %s1059_s9 = scalar_lea.hbm %s1241_s5, 2048 }
 0x25d   :  { %p1060_p3 = scmp.ne.s32.totalorder %s1241_s5, %s1059_s9  ;;  %p1063_p4 = scmp.lt.u32.totalorder %s1059_s9, %s1241_s5 }
 0x25f   :  { %p1065_p5 = pnand %p1063_p4, %p1060_p3 }
 0x261   :  { %1068 = shalt.err (!%p1065_p5)
}
 0x262   :  { %647 = dma.vmem_to_hbm [thread:$0]  %s642_s3, 2048, %s1241_s5, [#allocation5], %s1079_s30, %s1079_s30, %s1080_s6  }
 0x263   :  { %1075 = dma.done.wait [#allocation5], 2048  }
 0x264   :  { %1076 = vsyncadd [#allocation5], 4294965248 }
 0x265   :  { %651 = vsyncpa [#allocation4], 1 }
 0x266   :  { %652 = vsyncpa [#allocation7], 1 }
 0x267   :  { %653 = vsyncpa [#allocation10], 1 }
 0x268   :  { %654 = vsyncpa [#allocation5], 1 }

</bundles_post_ra>
